<compile_context>
chip_gen: v7x
topology: tpu7x:2x2x1
jax: 0.10.0
libtpu: 0.0.40
codegen_flags: <defaults>
</compile_context>

<pallas_src>
import functools

import jax
import jax.numpy as jnp
import numpy as np
from jax.experimental import pallas as pl
from jax.experimental.pallas import tpu as pltpu


# --------------------------------------------------------------------------
# Pallas kernel.
#
# Layout (everything transposed so anchors live on TPU lanes):
#   qT  : (D, tq)   query tile, features on sublanes
#   q2  : (1, tq)   query squared norms
#   ql  : (1, tq)   query labels (int32)
#   r   : (tm, D)   reference tile
#   rl  : (tm, 1)   reference labels (int32)
#   r2  : (tm, 1)   reference squared norms
# Outputs (one lane-dense (1, tq) row per query tile, accumulated across the
# inner M-tile grid axis directly in the VMEM-resident output blocks):
#   pos_idx, neg_idx : int32 hardest-positive / hardest-negative ref index
#   pos_d,  neg_d    : f32 corresponding L2 distances
# --------------------------------------------------------------------------
def _batch_hard_miner_kernel(qT_ref, q2_ref, ql_ref, r_ref, rl_ref, r2_ref,
                             pos_idx_ref, neg_idx_ref, pos_d_ref, neg_d_ref,
                             *, same_set, num_refs):
    k = pl.program_id(1)
    tm = r_ref.shape[0]
    tq = q2_ref.shape[1]

    NEG_INF = jnp.float32(-jnp.inf)
    POS_INF = jnp.float32(jnp.inf)
    sentinel = jnp.int32(num_refs)   # emitted when an anchor has no valid pos/neg

    @pl.when(k == 0)
    def _init():
        pos_d_ref[...] = jnp.full_like(pos_d_ref, NEG_INF)
        neg_d_ref[...] = jnp.full_like(neg_d_ref, POS_INF)
        pos_idx_ref[...] = jnp.full_like(pos_idx_ref, sentinel)
        neg_idx_ref[...] = jnp.full_like(neg_idx_ref, sentinel)

    # squared L2 distance:  ||r||^2 + ||q||^2 - 2 r.q   -> (tm, tq)
    rq = jnp.dot(r_ref[...], qT_ref[...], preferred_element_type=jnp.float32)
    d2 = jnp.maximum(r2_ref[...] + q2_ref[...] - 2.0 * rq, 0.0)

    label_eq = rl_ref[...] == ql_ref[...]                       # (tm, tq)

    ref_gidx = k * tm + jax.lax.broadcasted_iota(jnp.int32, (tm, tq), 0)
    ref_valid = ref_gidx < num_refs                             # mask M padding

    if same_set:
        i = pl.program_id(0)
        anchor_gidx = i * tq + jax.lax.broadcasted_iota(jnp.int32, (tm, tq), 1)
        pos_valid = jnp.logical_and(
            jnp.logical_and(label_eq, ref_gidx != anchor_gidx), ref_valid)
    else:
        pos_valid = jnp.logical_and(label_eq, ref_valid)
    neg_valid = jnp.logical_and(jnp.logical_not(label_eq), ref_valid)

    d_pos = jnp.where(pos_valid, d2, NEG_INF)
    d_neg = jnp.where(neg_valid, d2, POS_INF)

    tile_pos_max = jnp.max(d_pos, axis=0, keepdims=True)        # (1, tq)
    tile_neg_min = jnp.min(d_neg, axis=0, keepdims=True)        # (1, tq)

    # smallest ref index achieving the tile extremum; together with the
    # strictly-better merge below (tiles visited in increasing k) this keeps
    # the global "smallest index on equal distance" tie-break.
    tile_pos_idx = jnp.min(
        jnp.where(jnp.logical_and(pos_valid, d_pos == tile_pos_max),
                  ref_gidx, sentinel), axis=0, keepdims=True)
    tile_neg_idx = jnp.min(
        jnp.where(jnp.logical_and(neg_valid, d_neg == tile_neg_min),
                  ref_gidx, sentinel), axis=0, keepdims=True)

    pos_better = tile_pos_max > pos_d_ref[...]
    neg_better = tile_neg_min < neg_d_ref[...]
    pos_idx_ref[...] = jnp.where(pos_better, tile_pos_idx, pos_idx_ref[...])
    neg_idx_ref[...] = jnp.where(neg_better, tile_neg_idx, neg_idx_ref[...])
    pos_d_ref[...] = jnp.maximum(pos_d_ref[...], tile_pos_max)
    neg_d_ref[...] = jnp.minimum(neg_d_ref[...], tile_neg_min)

    @pl.when(k == pl.num_programs(1) - 1)
    def _finalize():
        pd = pos_d_ref[...]
        pos_d_ref[...] = jnp.where(pd == NEG_INF, NEG_INF,
                                   jnp.sqrt(jnp.maximum(pd, 0.0)))
        neg_d_ref[...] = jnp.sqrt(jnp.maximum(neg_d_ref[...], 0.0))


# --------------------------------------------------------------------------
# Wrapper around pallas_call (the "miner")
# --------------------------------------------------------------------------
def batch_hard_miner(embeddings, labels, ref_emb=None, ref_labels=None, *,
                     tq=128, tm=512, use_bf16_matmul=False):
    assert tq % 128 == 0, "query tile must be a multiple of 128 (lane dim)"
    assert tm % 8 == 0, "ref tile must be a multiple of 8 (sublane dim)"

    same_set = ref_emb is None
    if same_set:
        ref_emb, ref_labels = embeddings, labels

    emb = jnp.asarray(embeddings, jnp.float32)
    ref = jnp.asarray(ref_emb, jnp.float32)
    N, D = emb.shape
    M = ref.shape[0]

    n_pad = (-N) % tq
    m_pad = (-M) % tm
    Np, Mp = N + n_pad, M + m_pad

    # query side: transposed + lane-dense (anchors on lanes); norms precomputed
    qT = jnp.pad(emb, ((0, n_pad), (0, 0))).T                       # (D, Np)
    q2 = jnp.pad(jnp.sum(emb * emb, axis=-1), (0, n_pad)).reshape(1, Np)
    ql = jnp.pad(jnp.asarray(labels, jnp.int32).reshape(-1),
                 (0, n_pad)).reshape(1, Np)

    # reference side: tiled along the M grid axis; norms precomputed
    refp = jnp.pad(ref, ((0, m_pad), (0, 0)))                       # (Mp, D)
    r2 = jnp.pad(jnp.sum(ref * ref, axis=-1), (0, m_pad)).reshape(Mp, 1)
    rl = jnp.pad(jnp.asarray(ref_labels, jnp.int32).reshape(-1),
                 (0, m_pad)).reshape(Mp, 1)

    if use_bf16_matmul:
        # halves HBM/VMEM traffic for the matmul operands on v6e/v7x; distance
        # correction and comparisons stay in f32 (index ties may differ vs f32)
        qT = qT.astype(jnp.bfloat16)
        refp = refp.astype(jnp.bfloat16)

    kernel = functools.partial(_batch_hard_miner_kernel,
                               same_set=same_set, num_refs=M)

    grid_spec = pltpu.PrefetchScalarGridSpec(
        num_scalar_prefetch=0,
        grid=(Np // tq, Mp // tm),
        in_specs=[
            pl.BlockSpec((D, tq), lambda i, k: (0, i)),    # qT tile
            pl.BlockSpec((1, tq), lambda i, k: (0, i)),    # q2
            pl.BlockSpec((1, tq), lambda i, k: (0, i)),    # q labels
            pl.BlockSpec((tm, D), lambda i, k: (k, 0)),    # ref tile
            pl.BlockSpec((tm, 1), lambda i, k: (k, 0)),    # ref labels
            pl.BlockSpec((tm, 1), lambda i, k: (k, 0)),    # ref sq-norms
        ],
        out_specs=[
            pl.BlockSpec((1, tq), lambda i, k: (0, i)),
            pl.BlockSpec((1, tq), lambda i, k: (0, i)),
            pl.BlockSpec((1, tq), lambda i, k: (0, i)),
            pl.BlockSpec((1, tq), lambda i, k: (0, i)),
        ],
    )

    out_shapes = (
        jax.ShapeDtypeStruct((1, Np), jnp.int32),    # hardest-positive index
        jax.ShapeDtypeStruct((1, Np), jnp.int32),    # hardest-negative index
        jax.ShapeDtypeStruct((1, Np), jnp.float32),  # hardest-positive distance
        jax.ShapeDtypeStruct((1, Np), jnp.float32),  # hardest-negative distance
    )

    pos_idx, neg_idx, pos_d, neg_d = pl.pallas_call(
        kernel,
        out_shape=out_shapes,
        grid_spec=grid_spec,
        compiler_params=pltpu.CompilerParams(
            dimension_semantics=("parallel", "arbitrary")),
    )(qT, q2, ql, refp, rl, r2)

    anchors = jnp.arange(N, dtype=jnp.int32)
    # (anchor, hardest-positive, hardest-negative) triplets + their distances
    return (anchors, pos_idx[0, :N], neg_idx[0, :N],
            pos_d[0, :N], neg_d[0, :N])


# --------------------------------------------------------------------------
# DistributedMinerWrapper equivalent (single device => all_gather is identity)
# --------------------------------------------------------------------------
def all_gather_embeddings_labels(embeddings, labels):
    if isinstance(embeddings, (list, tuple)):
        assert isinstance(labels, (list, tuple))
        embeddings = jnp.concatenate(list(embeddings), axis=0)
        labels = jnp.concatenate(list(labels), axis=0)
    return embeddings, labels


class DistributedMinerWrapper:
    def __init__(self, miner):
        self.miner = miner

    def __call__(self, embeddings, labels, ref_emb=None, ref_labels=None):
        embeddings, labels = all_gather_embeddings_labels(embeddings, labels)
        if ref_emb is not None:
            ref_emb, ref_labels = all_gather_embeddings_labels(ref_emb, ref_labels)
        return self.miner(embeddings, labels, ref_emb, ref_labels)


# --------------------------------------------------------------------------
# Pure-numpy reference for correctness checks
# --------------------------------------------------------------------------
def _ref_batch_hard(emb, lab, ref=None, rlab=None):
    same = ref is None
    if same:
        ref, rlab = emb, lab
    emb = np.asarray(emb, np.float32)
    ref = np.asarray(ref, np.float32)
    lab = np.asarray(lab)
    rlab = np.asarray(rlab)
    n, m = emb.shape[0], ref.shape[0]
    d2 = np.maximum((emb * emb).sum(-1, keepdims=True)
                    + (ref * ref).sum(-1)[None, :] - 2.0 * emb @ ref.T, 0.0)
    eq = lab[:, None] == rlab[None, :]
    self_m = np.eye(n, m, dtype=bool) if same else np.zeros((n, m), bool)
    pos_idx = np.empty(n, np.int32)
    neg_idx = np.empty(n, np.int32)
    for i in range(n):
        pv = eq[i] & ~self_m[i]
        nv = ~eq[i]
        pos_idx[i] = np.where(pv, d2[i], -np.inf).argmax() if pv.any() else m
        neg_idx[i] = np.where(nv, d2[i], np.inf).argmin() if nv.any() else m
    return pos_idx, neg_idx


if __name__ == "__main__":
    key = jax.random.PRNGKey(0)
    N, D = 16, 32                       # 16 gathered embeddings, hidden dim 32
    k_emb, k_ref = jax.random.split(key)
    embeddings = jax.random.normal(k_emb, (N, D), dtype=jnp.float32)
    labels = jnp.array(np.arange(N) % 4, dtype=jnp.int32)  # 4 classes, 4 each

    wrapper = DistributedMinerWrapper(batch_hard_miner)

    # 1) ref_emb=None path: miner mines within the gathered batch itself
    a, p, n, pd, nd = wrapper(embeddings, labels)
    jax.block_until_ready((a, p, n, pd, nd))
    ref_p, ref_n = _ref_batch_hard(np.asarray(embeddings), np.asarray(labels))
    assert np.array_equal(np.asarray(p), ref_p), "hardest-positive mismatch"
    assert np.array_equal(np.asarray(n), ref_n), "hardest-negative mismatch"

    # 2) list-of-embeddings concat path of the wrapper
    a2, p2, n2, _, _ = wrapper([embeddings[:8], embeddings[8:]],
                               [labels[:8], labels[8:]])
    jax.block_until_ready((a2, p2, n2))
    assert np.array_equal(np.asarray(p2), ref_p)
    assert np.array_equal(np.asarray(n2), ref_n)

    # 3) cross-set (ref_emb provided) path
    ref_emb = jax.random.normal(k_ref, (N, D), dtype=jnp.float32)
    ref_labels = jnp.array((np.arange(N) // 2) % 4, dtype=jnp.int32)
    _, p3, n3, _, _ = wrapper(embeddings, labels, ref_emb, ref_labels)
    jax.block_until_ready((p3, n3))
    ref_p3, ref_n3 = _ref_batch_hard(np.asarray(embeddings), np.asarray(labels),
                                     np.asarray(ref_emb), np.asarray(ref_labels))
    assert np.array_equal(np.asarray(p3), ref_p3)
    assert np.array_equal(np.asarray(n3), ref_n3)

    # 4) small ref tile (tm=8) so the inner M-tile grid axis actually has
    #    multiple steps -> exercises the cross-tile accumulator / tie-break
    tiled_wrapper = DistributedMinerWrapper(
        functools.partial(batch_hard_miner, tq=128, tm=8))
    _, p4, n4, _, _ = tiled_wrapper(embeddings, labels)
    jax.block_until_ready((p4, n4))
    assert np.array_equal(np.asarray(p4), ref_p)
    assert np.array_equal(np.asarray(n4), ref_n)

    print("KERNEL_OK")
</pallas_src>

<mosaic_0001>
module attributes {stable_mosaic.version = 11 : i64} {
  func.func @_batch_hard_miner_kernel(%arg0: i32, %arg1: i32, %arg2: memref<32x128xf32, #tpu.memory_space<vmem>>, %arg3: memref<1x128xf32, #tpu.memory_space<vmem>>, %arg4: memref<1x128xi32, #tpu.memory_space<vmem>>, %arg5: memref<512x32xf32, #tpu.memory_space<vmem>>, %arg6: memref<512x1xi32, #tpu.memory_space<vmem>>, %arg7: memref<512x1xf32, #tpu.memory_space<vmem>>, %arg8: memref<1x128xi32, #tpu.memory_space<vmem>>, %arg9: memref<1x128xi32, #tpu.memory_space<vmem>>, %arg10: memref<1x128xf32, #tpu.memory_space<vmem>>, %arg11: memref<1x128xf32, #tpu.memory_space<vmem>>) attributes {dimension_semantics = [#tpu.dimension_semantics<parallel>, #tpu.dimension_semantics<arbitrary>], iteration_bounds = array<i64: 1, 1>, scalar_prefetch = 0 : i64, scratch_operands = 0 : i64, tpu.core_type = #tpu.core_type<tc>, window_params = [{transform_indices = @transform_0, window_bounds = array<i64: 32, 128>}, {transform_indices = @transform_1, window_bounds = array<i64: 1, 128>}, {transform_indices = @transform_2, window_bounds = array<i64: 1, 128>}, {transform_indices = @transform_3, window_bounds = array<i64: 512, 32>}, {transform_indices = @transform_4, window_bounds = array<i64: 512, 1>}, {transform_indices = @transform_5, window_bounds = array<i64: 512, 1>}, {transform_indices = @transform_6, window_bounds = array<i64: 1, 128>}, {transform_indices = @transform_7, window_bounds = array<i64: 1, 128>}, {transform_indices = @transform_8, window_bounds = array<i64: 1, 128>}, {transform_indices = @transform_9, window_bounds = array<i64: 1, 128>}]} {
    %c0_i32 = arith.constant 0 : i32
    %0 = arith.cmpi eq, %arg1, %c0_i32 : i32
    %1 = arith.extui %0 : i1 to i32
    %cst = arith.constant 0xFF800000 : f32
    %cst_0 = arith.constant 0x7F800000 : f32
    %c16_i32 = arith.constant 16 : i32
    %c0_i32_1 = arith.constant 0 : i32
    %2 = arith.cmpi ne, %1, %c0_i32_1 : i32
    scf.if %2 {
      %77 = vector.broadcast %cst : f32 to vector<1x128xf32>
      %c0_49 = arith.constant 0 : index
      %c0_50 = arith.constant 0 : index
      %78 = vector.load %arg10[%c0_49, %c0_50] : memref<1x128xf32, #tpu.memory_space<vmem>>, vector<1x128xf32>
      tpu.vector_store %arg10[%c0_49, %c0_50], %77 {strides = array<i32>} : memref<1x128xf32, #tpu.memory_space<vmem>>, vector<1x128xf32>,
      %79 = vector.broadcast %cst_0 : f32 to vector<1x128xf32>
      %c0_51 = arith.constant 0 : index
      %c0_52 = arith.constant 0 : index
      %80 = vector.load %arg11[%c0_51, %c0_52] : memref<1x128xf32, #tpu.memory_space<vmem>>, vector<1x128xf32>
      tpu.vector_store %arg11[%c0_51, %c0_52], %79 {strides = array<i32>} : memref<1x128xf32, #tpu.memory_space<vmem>>, vector<1x128xf32>,
      %81 = vector.broadcast %c16_i32 : i32 to vector<1x128xi32>
      %c0_53 = arith.constant 0 : index
      %c0_54 = arith.constant 0 : index
      %82 = vector.load %arg8[%c0_53, %c0_54] : memref<1x128xi32, #tpu.memory_space<vmem>>, vector<1x128xi32>
      tpu.vector_store %arg8[%c0_53, %c0_54], %81 {strides = array<i32>} : memref<1x128xi32, #tpu.memory_space<vmem>>, vector<1x128xi32>,
      %83 = vector.broadcast %c16_i32 : i32 to vector<1x128xi32>
      %c0_55 = arith.constant 0 : index
      %c0_56 = arith.constant 0 : index
      %84 = vector.load %arg9[%c0_55, %c0_56] : memref<1x128xi32, #tpu.memory_space<vmem>>, vector<1x128xi32>
      tpu.vector_store %arg9[%c0_55, %c0_56], %83 {strides = array<i32>} : memref<1x128xi32, #tpu.memory_space<vmem>>, vector<1x128xi32>,
    } else {
    }
    %c0 = arith.constant 0 : index
    %c0_2 = arith.constant 0 : index
    %3 = vector.load %arg5[%c0, %c0_2] : memref<512x32xf32, #tpu.memory_space<vmem>>, vector<512x32xf32>
    %c0_3 = arith.constant 0 : index
    %c0_4 = arith.constant 0 : index
    %4 = vector.load %arg2[%c0_3, %c0_4] : memref<32x128xf32, #tpu.memory_space<vmem>>, vector<32x128xf32>
    %cst_5 = arith.constant dense<0.000000e+00> : vector<512x128xf32>
    %5 = tpu.matmul %3, %4, %cst_5 {dimension_numbers = #tpu.dot_dimension_numbers<[1], [0], [0], [1], [0, 0, 1, 1], [], []>} : vector<512x32xf32>, vector<32x128xf32>, vector<512x128xf32> -> vector<512x128xf32>
    %c0_6 = arith.constant 0 : index
    %c0_7 = arith.constant 0 : index
    %6 = vector.load %arg7[%c0_6, %c0_7] : memref<512x1xf32, #tpu.memory_space<vmem>>, vector<512x1xf32>
    %c0_8 = arith.constant 0 : index
    %c0_9 = arith.constant 0 : index
    %7 = vector.load %arg3[%c0_8, %c0_9] : memref<1x128xf32, #tpu.memory_space<vmem>>, vector<1x128xf32>
    %8 = vector.broadcast %6 : vector<512x1xf32> to vector<512x128xf32>
    %9 = vector.broadcast %7 : vector<1x128xf32> to vector<512x128xf32>
    %10 = arith.addf %8, %9 : vector<512x128xf32>
    %cst_10 = arith.constant 2.000000e+00 : f32
    %11 = vector.broadcast %cst_10 : f32 to vector<512x128xf32>
    %12 = arith.mulf %11, %5 : vector<512x128xf32>
    %13 = arith.subf %10, %12 : vector<512x128xf32>
    %cst_11 = arith.constant 0.000000e+00 : f32
    %14 = vector.broadcast %cst_11 : f32 to vector<512x128xf32>
    %15 = arith.maximumf %13, %14 : vector<512x128xf32>
    %c0_12 = arith.constant 0 : index
    %c0_13 = arith.constant 0 : index
    %16 = vector.load %arg6[%c0_12, %c0_13] : memref<512x1xi32, #tpu.memory_space<vmem>>, vector<512x1xi32>
    %c0_14 = arith.constant 0 : index
    %c0_15 = arith.constant 0 : index
    %17 = vector.load %arg4[%c0_14, %c0_15] : memref<1x128xi32, #tpu.memory_space<vmem>>, vector<1x128xi32>
    %18 = vector.broadcast %16 : vector<512x1xi32> to vector<512x128xi32>
    %19 = vector.broadcast %17 : vector<1x128xi32> to vector<512x128xi32>
    %20 = arith.cmpi eq, %18, %19 : vector<512x128xi32>
    %c512_i32 = arith.constant 512 : i32
    %21 = arith.muli %arg1, %c512_i32 : i32
    %22 = tpu.iota {dimensions = array<i32: 0>} : vector<512x128xi32>
    %23 = vector.broadcast %21 : i32 to vector<512x128xi32>
    %24 = arith.addi %23, %22 : vector<512x128xi32>
    %c16_i32_16 = arith.constant 16 : i32
    %25 = vector.broadcast %c16_i32_16 : i32 to vector<512x128xi32>
    %26 = arith.cmpi slt, %24, %25 : vector<512x128xi32>
    %c128_i32 = arith.constant 128 : i32
    %27 = arith.muli %arg0, %c128_i32 : i32
    %28 = tpu.iota {dimensions = array<i32: 1>} : vector<512x128xi32>
    %29 = vector.broadcast %27 : i32 to vector<512x128xi32>
    %30 = arith.addi %29, %28 : vector<512x128xi32>
    %31 = arith.cmpi ne, %24, %30 : vector<512x128xi32>
    %32 = arith.andi %20, %31 : vector<512x128xi1>
    %33 = arith.andi %32, %26 : vector<512x128xi1>
    %cst_17 = arith.constant dense<true> : vector<512x128xi1>
    %34 = arith.xori %20, %cst_17 : vector<512x128xi1>
    %35 = arith.andi %34, %26 : vector<512x128xi1>
    %cst_18 = arith.constant 0xFF800000 : f32
    %36 = vector.broadcast %cst_18 : f32 to vector<512x128xf32>
    %37 = arith.select %33, %15, %36 : vector<512x128xi1>, vector<512x128xf32>
    %cst_19 = arith.constant 0x7F800000 : f32
    %38 = vector.broadcast %cst_19 : f32 to vector<512x128xf32>
    %39 = arith.select %35, %15, %38 : vector<512x128xi1>, vector<512x128xf32>
    %cst_20 = arith.constant dense<0xFF800000> : vector<128xf32>
    %40 = vector.multi_reduction <maximumf>, %37, %cst_20 [0] : vector<512x128xf32> to vector<128xf32>
    %41 = vector.shape_cast %40 : vector<128xf32> to vector<1x128xf32>
    %cst_21 = arith.constant dense<0x7F800000> : vector<128xf32>
    %42 = vector.multi_reduction <minimumf>, %39, %cst_21 [0] : vector<512x128xf32> to vector<128xf32>
    %43 = vector.shape_cast %42 : vector<128xf32> to vector<1x128xf32>
    %44 = vector.broadcast %41 : vector<1x128xf32> to vector<512x128xf32>
    %45 = arith.cmpf oeq, %37, %44 : vector<512x128xf32>
    %46 = arith.andi %33, %45 : vector<512x128xi1>
    %c16_i32_22 = arith.constant 16 : i32
    %47 = vector.broadcast %c16_i32_22 : i32 to vector<512x128xi32>
    %48 = arith.select %46, %24, %47 : vector<512x128xi1>, vector<512x128xi32>
    %cst_23 = arith.constant dense<2147483647> : vector<128xi32>
    %49 = vector.multi_reduction <minsi>, %48, %cst_23 [0] : vector<512x128xi32> to vector<128xi32>
    %50 = vector.shape_cast %49 : vector<128xi32> to vector<1x128xi32>
    %51 = vector.broadcast %43 : vector<1x128xf32> to vector<512x128xf32>
    %52 = arith.cmpf oeq, %39, %51 : vector<512x128xf32>
    %53 = arith.andi %35, %52 : vector<512x128xi1>
    %c16_i32_24 = arith.constant 16 : i32
    %54 = vector.broadcast %c16_i32_24 : i32 to vector<512x128xi32>
    %55 = arith.select %53, %24, %54 : vector<512x128xi1>, vector<512x128xi32>
    %cst_25 = arith.constant dense<2147483647> : vector<128xi32>
    %56 = vector.multi_reduction <minsi>, %55, %cst_25 [0] : vector<512x128xi32> to vector<128xi32>
    %57 = vector.shape_cast %56 : vector<128xi32> to vector<1x128xi32>
    %c0_26 = arith.constant 0 : index
    %c0_27 = arith.constant 0 : index
    %58 = vector.load %arg10[%c0_26, %c0_27] : memref<1x128xf32, #tpu.memory_space<vmem>>, vector<1x128xf32>
    %59 = arith.cmpf ogt, %41, %58 : vector<1x128xf32>
    %c0_28 = arith.constant 0 : index
    %c0_29 = arith.constant 0 : index
    %60 = vector.load %arg11[%c0_28, %c0_29] : memref<1x128xf32, #tpu.memory_space<vmem>>, vector<1x128xf32>
    %61 = arith.cmpf olt, %43, %60 : vector<1x128xf32>
    %c0_30 = arith.constant 0 : index
    %c0_31 = arith.constant 0 : index
    %62 = vector.load %arg8[%c0_30, %c0_31] : memref<1x128xi32, #tpu.memory_space<vmem>>, vector<1x128xi32>
    %63 = arith.select %59, %50, %62 : vector<1x128xi1>, vector<1x128xi32>
    %c0_32 = arith.constant 0 : index
    %c0_33 = arith.constant 0 : index
    %64 = vector.load %arg8[%c0_32, %c0_33] : memref<1x128xi32, #tpu.memory_space<vmem>>, vector<1x128xi32>
    tpu.vector_store %arg8[%c0_32, %c0_33], %63 {strides = array<i32>} : memref<1x128xi32, #tpu.memory_space<vmem>>, vector<1x128xi32>,
    %c0_34 = arith.constant 0 : index
    %c0_35 = arith.constant 0 : index
    %65 = vector.load %arg9[%c0_34, %c0_35] : memref<1x128xi32, #tpu.memory_space<vmem>>, vector<1x128xi32>
    %66 = arith.select %61, %57, %65 : vector<1x128xi1>, vector<1x128xi32>
    %c0_36 = arith.constant 0 : index
    %c0_37 = arith.constant 0 : index
    %67 = vector.load %arg9[%c0_36, %c0_37] : memref<1x128xi32, #tpu.memory_space<vmem>>, vector<1x128xi32>
    tpu.vector_store %arg9[%c0_36, %c0_37], %66 {strides = array<i32>} : memref<1x128xi32, #tpu.memory_space<vmem>>, vector<1x128xi32>,
    %c0_38 = arith.constant 0 : index
    %c0_39 = arith.constant 0 : index
    %68 = vector.load %arg10[%c0_38, %c0_39] : memref<1x128xf32, #tpu.memory_space<vmem>>, vector<1x128xf32>
    %69 = arith.maximumf %68, %41 : vector<1x128xf32>
    %c0_40 = arith.constant 0 : index
    %c0_41 = arith.constant 0 : index
    %70 = vector.load %arg10[%c0_40, %c0_41] : memref<1x128xf32, #tpu.memory_space<vmem>>, vector<1x128xf32>
    tpu.vector_store %arg10[%c0_40, %c0_41], %69 {strides = array<i32>} : memref<1x128xf32, #tpu.memory_space<vmem>>, vector<1x128xf32>,
    %c0_42 = arith.constant 0 : index
    %c0_43 = arith.constant 0 : index
    %71 = vector.load %arg11[%c0_42, %c0_43] : memref<1x128xf32, #tpu.memory_space<vmem>>, vector<1x128xf32>
    %72 = arith.minimumf %71, %43 : vector<1x128xf32>
    %c0_44 = arith.constant 0 : index
    %c0_45 = arith.constant 0 : index
    %73 = vector.load %arg11[%c0_44, %c0_45] : memref<1x128xf32, #tpu.memory_space<vmem>>, vector<1x128xf32>
    tpu.vector_store %arg11[%c0_44, %c0_45], %72 {strides = array<i32>} : memref<1x128xf32, #tpu.memory_space<vmem>>, vector<1x128xf32>,
    %c0_i32_46 = arith.constant 0 : i32
    %74 = arith.cmpi eq, %arg1, %c0_i32_46 : i32
    %75 = arith.extui %74 : i1 to i32
    %cst_47 = arith.constant 0xFF800000 : f32
    %c0_i32_48 = arith.constant 0 : i32
    %76 = arith.cmpi ne, %75, %c0_i32_48 : i32
    scf.if %76 {
      %c0_49 = arith.constant 0 : index
      %c0_50 = arith.constant 0 : index
      %77 = vector.load %arg10[%c0_49, %c0_50] : memref<1x128xf32, #tpu.memory_space<vmem>>, vector<1x128xf32>
      %78 = vector.broadcast %cst_47 : f32 to vector<1x128xf32>
      %79 = arith.cmpf oeq, %77, %78 : vector<1x128xf32>
      %cst_51 = arith.constant 0.000000e+00 : f32
      %80 = vector.broadcast %cst_51 : f32 to vector<1x128xf32>
      %81 = arith.maximumf %77, %80 : vector<1x128xf32>
      %82 = math.sqrt %81 : vector<1x128xf32>
      %83 = vector.broadcast %cst_47 : f32 to vector<1x128xf32>
      %84 = arith.select %79, %83, %82 : vector<1x128xi1>, vector<1x128xf32>
      %c0_52 = arith.constant 0 : index
      %c0_53 = arith.constant 0 : index
      %85 = vector.load %arg10[%c0_52, %c0_53] : memref<1x128xf32, #tpu.memory_space<vmem>>, vector<1x128xf32>
      tpu.vector_store %arg10[%c0_52, %c0_53], %84 {strides = array<i32>} : memref<1x128xf32, #tpu.memory_space<vmem>>, vector<1x128xf32>,
      %c0_54 = arith.constant 0 : index
      %c0_55 = arith.constant 0 : index
      %86 = vector.load %arg11[%c0_54, %c0_55] : memref<1x128xf32, #tpu.memory_space<vmem>>, vector<1x128xf32>
      %cst_56 = arith.constant 0.000000e+00 : f32
      %87 = vector.broadcast %cst_56 : f32 to vector<1x128xf32>
      %88 = arith.maximumf %86, %87 : vector<1x128xf32>
      %89 = math.sqrt %88 : vector<1x128xf32>
      %c0_57 = arith.constant 0 : index
      %c0_58 = arith.constant 0 : index
      %90 = vector.load %arg11[%c0_57, %c0_58] : memref<1x128xf32, #tpu.memory_space<vmem>>, vector<1x128xf32>
      tpu.vector_store %arg11[%c0_57, %c0_58], %89 {strides = array<i32>} : memref<1x128xf32, #tpu.memory_space<vmem>>, vector<1x128xf32>,
    } else {
    }
    return
  }
  func.func @transform_0(%arg0: i32, %arg1: i32) -> (i32, i32) {
    %c0_i32 = arith.constant 0 : i32
    %c0_i32_0 = arith.constant 0 : i32
    return %c0_i32, %arg0 : i32, i32
  }
  func.func @transform_1(%arg0: i32, %arg1: i32) -> (i32, i32) {
    %c0_i32 = arith.constant 0 : i32
    %c0_i32_0 = arith.constant 0 : i32
    return %c0_i32, %arg0 : i32, i32
  }
  func.func @transform_2(%arg0: i32, %arg1: i32) -> (i32, i32) {
    %c0_i32 = arith.constant 0 : i32
    %c0_i32_0 = arith.constant 0 : i32
    return %c0_i32, %arg0 : i32, i32
  }
  func.func @transform_3(%arg0: i32, %arg1: i32) -> (i32, i32) {
    %c0_i32 = arith.constant 0 : i32
    %c0_i32_0 = arith.constant 0 : i32
    return %arg1, %c0_i32 : i32, i32
  }
  func.func @transform_4(%arg0: i32, %arg1: i32) -> (i32, i32) {
    %c0_i32 = arith.constant 0 : i32
    %c0_i32_0 = arith.constant 0 : i32
    return %arg1, %c0_i32 : i32, i32
  }
  func.func @transform_5(%arg0: i32, %arg1: i32) -> (i32, i32) {
    %c0_i32 = arith.constant 0 : i32
    %c0_i32_0 = arith.constant 0 : i32
    return %arg1, %c0_i32 : i32, i32
  }
  func.func @transform_6(%arg0: i32, %arg1: i32) -> (i32, i32) {
    %c0_i32 = arith.constant 0 : i32
    %c0_i32_0 = arith.constant 0 : i32
    return %c0_i32, %arg0 : i32, i32
  }
  func.func @transform_7(%arg0: i32, %arg1: i32) -> (i32, i32) {
    %c0_i32 = arith.constant 0 : i32
    %c0_i32_0 = arith.constant 0 : i32
    return %c0_i32, %arg0 : i32, i32
  }
  func.func @transform_8(%arg0: i32, %arg1: i32) -> (i32, i32) {
    %c0_i32 = arith.constant 0 : i32
    %c0_i32_0 = arith.constant 0 : i32
    return %c0_i32, %arg0 : i32, i32
  }
  func.func @transform_9(%arg0: i32, %arg1: i32) -> (i32, i32) {
    %c0_i32 = arith.constant 0 : i32
    %c0_i32_0 = arith.constant 0 : i32
    return %c0_i32, %arg0 : i32, i32
  }
}

</mosaic_0001>

<bundles_post_ra>
// kernel: tpu_custom_call.1
= control target key start
LH: loop header
LB: loop body
LE: loop exit
PB: predicated region body
PF: predicated region fallthrough
CT: control target
= control target key end

     0   :  { %15 = vsyncpa [#allocation3], 0  ;;  %s4189_s0 = inlined_call_operand.vmem [shape: f32[32,128], index: 0, kind: input, shape index: {}]   ;;  %s4190_s1 = inlined_call_operand.vmem [shape: f32[1,128], index: 1, kind: input, shape index: {}]   ;;  %s4191_s2 = inlined_call_operand.vmem [shape: s32[1,128], index: 2, kind: input, shape index: {}]   ;;  %s4192_s3 = inlined_call_operand.vmem [shape: f32[512,32], index: 3, kind: input, shape index: {}]   ;;  %s4193_s4 = inlined_call_operand.vmem [shape: s32[512,1], index: 4, kind: input, shape index: {}]   ;;  %s4194_s5 = inlined_call_operand.vmem [shape: f32[512,1], index: 5, kind: input, shape index: {}]   ;;  %s4195_s6 = inlined_call_operand.hbm [shape: s32[1,128], index: 6, kind: output, shape index: {0}]   ;;  %s4196_s7 = inlined_call_operand.hbm [shape: s32[1,128], index: 7, kind: output, shape index: {1}]   ;;  %s4197_s8 = inlined_call_operand.hbm [shape: f32[1,128], index: 8, kind: output, shape index: {2}]   ;;  %s4198_s9 = inlined_call_operand.hbm [shape: f32[1,128], index: 9, kind: output, shape index: {3}]  }
   0x1   :  { %16 = vsyncpa [#allocation5], 0  ;;  %v102_v0 = vld [vmem:[%s4189_s0] sm:$0xff]  ;;  %v103_v1 = vld [vmem:[%s4189_s0 + $0x8] sm:$0xff]  ;;  %vm106_vm0 = vcmask 261120   ;;  %v3675_v6 = vmov 0  }
   0x2   :  { %v104_v2 = vld [vmem:[%s4189_s0 + $0x10] sm:$0xff]  ;;  %v3554_v3 = vpack.c.bf16 %v103_v1, %v102_v0  ;;  %v105_v4 = vld [vmem:[%s4189_s0 + $0x18] sm:$0xff]  ;;  %v38_v5 = vld [vmem:[%s4192_s3] sm:$0xff]  ;;  %3575 = vset.pattern.permute.xlu0 %v3675_v6  ;;  %3576 = vset.pattern.permute.xlu1 %v3675_v6 }
   0x3   :  { %v3558_v7 = vpack.c.bf16 %v105_v4, %v104_v2  ;;  %3458 = vmatprep.mubr.msk.f32.mxu0 %vm106_vm0, %v38_v5  ;;  %v70_v8 = vld [vmem:[%s4192_s3 + $0x100] sm:$0xff]  ;;  %v39_v9 = vld [vmem:[%s4192_s3 + $0x8] sm:$0xff]  ;;  %v40_v11 = vld [vmem:[%s4192_s3 + $0x10] sm:$0xff] }
   0x4   :  { %3555 = vmatprep.subr.bf16.mxu0 %v3554_v3  ;;  %3562 = vmatprep.subr.bf16.mxu1 %v3554_v3  ;;  %v71_v10 = vld [vmem:[%s4192_s3 + $0x108] sm:$0xff]  ;;  %v72_v12 = vld [vmem:[%s4192_s3 + $0x110] sm:$0xff]  ;;  %v41_v13 = vld [vmem:[%s4192_s3 + $0x18] sm:$0xff] }
   0x5   :  { %3557 = vmatpush3.bf16.msra.mxu0 %v3554_v3  ;;  %3564 = vmatpush3.bf16.msra.mxu1 %v3554_v3  ;;  %v73_v14 = vld [vmem:[%s4192_s3 + $0x118] sm:$0xff]  ;;  %v42_v15 = vld [vmem:[%s4192_s3 + $0x20] sm:$0xff]  ;;  %v43_v17 = vld [vmem:[%s4192_s3 + $0x28] sm:$0xff] }
   0x6   :  { %3559 = vmatprep.subr.bf16.mxu0 %v3558_v7  ;;  %3563 = vmatprep.subr.bf16.mxu1 %v3558_v7  ;;  %v74_v16 = vld [vmem:[%s4192_s3 + $0x120] sm:$0xff]  ;;  %v75_v18 = vld [vmem:[%s4192_s3 + $0x128] sm:$0xff]  ;;  %v44_v19 = vld [vmem:[%s4192_s3 + $0x30] sm:$0xff] }
   0x7   :  { %3506 = vmatprep.mubr.msk.f32.mxu1 %vm106_vm0, %v70_v8  ;;  %v76_v20 = vld [vmem:[%s4192_s3 + $0x130] sm:$0xff]  ;;  %v45_v21 = vld [vmem:[%s4192_s3 + $0x38] sm:$0xff]  ;;  %v46_v23 = vld [vmem:[%s4192_s3 + $0x40] sm:$0xff] }
   0x8   :  { %v77_v22 = vld [vmem:[%s4192_s3 + $0x138] sm:$0xff]  ;;  %v78_v24 = vld [vmem:[%s4192_s3 + $0x140] sm:$0xff]  ;;  %v47_v27 = vld [vmem:[%s4192_s3 + $0x48] sm:$0xff] }
   0x9   :  { %3561 = vmatpush3.bf16.msra.mxu0 %v3558_v7  ;;  %3565 = vmatpush3.bf16.msra.mxu1 %v3558_v7  ;;  %v684_v25 = vld [vmem:[%s4194_s5] sm:$0xff]  ;;  %v79_v28 = vld [vmem:[%s4192_s3 + $0x148] sm:$0xff] }
   0xa   :  { %v1331_v26 = vld [vmem:[%s4193_s4] sm:$0xff] }
   0xc   :  { %3459 = vmatmul.mubr.msk.f32.vlgmr.msra.gmra.mrb[0].mxu0 %vm106_vm0, %v39_v9  ;;  %3507 = vmatmul.mubr.msk.f32.vlgmr.msra.gmra.mrb[0].mxu1 %vm106_vm0, %v71_v10 }
   0xd   :  { %3461 = vmatprep.mubr.msk.f32.mxu0 %vm106_vm0, %v40_v11  ;;  %3509 = vmatprep.mubr.msk.f32.mxu1 %vm106_vm0, %v72_v12 }
  0x10   :  { %3462 = vmatmul.mubr.msk.f32.gmra.mrb[2].mxu0 %vm106_vm0, %v41_v13  ;;  %3510 = vmatmul.mubr.msk.f32.gmra.mrb[2].mxu1 %vm106_vm0, %v73_v14 }
  0x11   :  { %3464 = vmatprep.mubr.msk.f32.mxu0 %vm106_vm0, %v42_v15  ;;  %3512 = vmatprep.mubr.msk.f32.mxu1 %vm106_vm0, %v74_v16 }
  0x14   :  { %3465 = vmatmul.mubr.msk.f32.gmra.mrb[4].mxu0 %vm106_vm0, %v43_v17  ;;  %3513 = vmatmul.mubr.msk.f32.gmra.mrb[4].mxu1 %vm106_vm0, %v75_v18 }
  0x15   :  { %3467 = vmatprep.mubr.msk.f32.mxu0 %vm106_vm0, %v44_v19  ;;  %3515 = vmatprep.mubr.msk.f32.mxu1 %vm106_vm0, %v76_v20 }
  0x18   :  { %3468 = vmatmul.mubr.msk.f32.gmra.mrb[6].mxu0 %vm106_vm0, %v45_v21  ;;  %3516 = vmatmul.mubr.msk.f32.gmra.mrb[6].mxu1 %vm106_vm0, %v77_v22 }
  0x19   :  { %3470 = vmatprep.mubr.msk.f32.mxu0 %vm106_vm0, %v46_v23  ;;  %3518 = vmatprep.mubr.msk.f32.mxu1 %vm106_vm0, %v78_v24 }
  0x1a   :  { %17 = vsyncpa [#allocation8], 0  ;;  %v48_v29 = vld [vmem:[%s4192_s3 + $0x50] sm:$0xff]  ;;  %751 = vperm.xlu0 %3575, %v684_v25   ;;  %1397 = vperm.xlu1 %3576, %v1331_v26   ;;  %v685_v31 = vld [vmem:[%s4194_s5 + $0x8] sm:$0xff]  ;;  %v3676_v11 = vmov inf   ;;  %v3677_v12 = vmov -inf   ;;  %v1657_v14 = vlaneseq }
  0x1b   :  { %v80_v30 = vld [vmem:[%s4192_s3 + $0x150] sm:$0xff]  ;;  %v1332_v32 = vld [vmem:[%s4193_s4 + $0x8] sm:$0xff]  ;;  %v49_v33 = vld [vmem:[%s4192_s3 + $0x58] sm:$0xff]  ;;  %35 = vst [vmem:[#allocation7] sm:$0x1] %v3676_v11  ;;  %v3678_v13 = vmov 16  }
  0x1c   :  { %3471 = vmatmul.mubr.msk.f32.gmra.mrb[8].mxu0 %vm106_vm0, %v47_v27  ;;  %3519 = vmatmul.mubr.msk.f32.gmra.mrb[8].mxu1 %vm106_vm0, %v79_v28  ;;  %v81_v34 = vld [vmem:[%s4192_s3 + $0x158] sm:$0xff]  ;;  %v50_v35 = vld [vmem:[%s4192_s3 + $0x60] sm:$0xff]  ;;  %v51_v37 = vld [vmem:[%s4192_s3 + $0x68] sm:$0xff]  ;;  %34 = vst [vmem:[#allocation6] sm:$0x1] %v3677_v12  ;;  %v4014_v17 = vshrl.u32 %v1657_v14, 7 }
  0x1d   :  { %3473 = vmatprep.mubr.msk.f32.mxu0 %vm106_vm0, %v48_v29  ;;  %3521 = vmatprep.mubr.msk.f32.mxu1 %vm106_vm0, %v80_v30  ;;  %v82_v36 = vld [vmem:[%s4192_s3 + $0x160] sm:$0xff]  ;;  %v83_v38 = vld [vmem:[%s4192_s3 + $0x168] sm:$0xff]  ;;  %v52_v39 = vld [vmem:[%s4192_s3 + $0x70] sm:$0xff]  ;;  %37 = vst [vmem:[#allocation4] sm:$0x1] %v3678_v13  ;;  %v1853_v18 = vand.u32 127, %v1657_v14 }
  0x1e   :  { %756 = vperm.xlu0 %3575, %v685_v31   ;;  %1400 = vperm.xlu1 %3576, %v1332_v32   ;;  %v84_v40 = vld [vmem:[%s4192_s3 + $0x170] sm:$0xff]  ;;  %v53_v41 = vld [vmem:[%s4192_s3 + $0x78] sm:$0xff]  ;;  %v54_v43 = vld [vmem:[%s4192_s3 + $0x80] sm:$0xff]  ;;  %36 = vst [vmem:[#allocation2] sm:$0x1] %v3678_v13  ;;  %v4023_v22 = vadd.s32 8, %v4014_v17 }
  0x1f   :  { %v85_v42 = vld [vmem:[%s4192_s3 + $0x178] sm:$0xff]  ;;  %v86_v44 = vld [vmem:[%s4192_s3 + $0x180] sm:$0xff]  ;;  %v55_v45 = vld [vmem:[%s4192_s3 + $0x88] sm:$0xff]  ;;  %vm1856_vm1 = vcmp.ne.s32.totalorder %v4014_v17, %v1853_v18  ;;  %vm3679_vm7 = vmmov 1   ;;  %s3681_s16 = smov [#allocation4]   ;;  %s3682_s18 = smov [#allocation6]  }
  0x20   :  { %3474 = vmatmul.mubr.msk.f32.gmra.mrb[10].mxu0 %vm106_vm0, %v49_v33  ;;  %3522 = vmatmul.mubr.msk.f32.gmra.mrb[10].mxu1 %vm106_vm0, %v81_v34  ;;  %v87_v46 = vld [vmem:[%s4192_s3 + $0x188] sm:$0xff]  ;;  %v56_v47 = vld [vmem:[%s4192_s3 + $0x90] sm:$0xff]  ;;  %v57_v49 = vld [vmem:[%s4192_s3 + $0x98] sm:$0xff]  ;;  %vm1857_vm3 = vcmp.ne.s32.totalorder %v4023_v22, %v1853_v18  ;;  %s3153_s17 = sshll.u32 %s3681_s16, 4  ;;  %s3163_s19 = sshll.u32 %s3682_s18, 4  ;;  %s4102_s17 = int_to_ptr.vmem [resolvable:$true] %s3153_s17  ;;  %s4106_s19 = int_to_ptr.vmem [resolvable:$true] %s3163_s19 }
  0x21   :  { %3476 = vmatprep.mubr.msk.f32.mxu0 %vm106_vm0, %v50_v35  ;;  %3524 = vmatprep.mubr.msk.f32.mxu1 %vm106_vm0, %v82_v36  ;;  %v88_v48 = vld [vmem:[%s4192_s3 + $0x190] sm:$0xff]  ;;  %v89_v50 = vld [vmem:[%s4192_s3 + $0x198] sm:$0xff]  ;;  %v58_v51 = vld [vmem:[%s4192_s3 + $0xa0] sm:$0xff]  ;;  %s3683_s20 = smov [#allocation7]  }
  0x22   :  { %v90_v52 = vld [vmem:[%s4192_s3 + $0x1a0] sm:$0xff]  ;;  %v59_v53 = vld [vmem:[%s4192_s3 + $0xa8] sm:$0xff]  ;;  %v60_v55 = vld [vmem:[%s4192_s3 + $0xb0] sm:$0xff]  ;;  %s3173_s0 = sshll.u32 %s3683_s20, 4  ;;  %s4133_s0 = int_to_ptr.vmem [resolvable:$true] %s3173_s0 }
  0x23   :  { %v91_v54 = vld [vmem:[%s4192_s3 + $0x1a8] sm:$0xff]  ;;  %v92_v56 = vld [vmem:[%s4192_s3 + $0x1b0] sm:$0xff]  ;;  %v61_v57 = vld [vmem:[%s4192_s3 + $0xb8] sm:$0xff] }
  0x24   :  { %3477 = vmatmul.mubr.msk.f32.gmra.mrb[12].mxu0 %vm106_vm0, %v51_v37  ;;  %3525 = vmatmul.mubr.msk.f32.gmra.mrb[12].mxu1 %vm106_vm0, %v83_v38  ;;  %v93_v58 = vld [vmem:[%s4192_s3 + $0x1b8] sm:$0xff]  ;;  %v62_v59 = vld [vmem:[%s4192_s3 + $0xc0] sm:$0xff]  ;;  %v63_v61 = vld [vmem:[%s4192_s3 + $0xc8] sm:$0xff] }
  0x25   :  { %3479 = vmatprep.mubr.msk.f32.mxu0 %vm106_vm0, %v52_v39  ;;  %3527 = vmatprep.mubr.msk.f32.mxu1 %vm106_vm0, %v84_v40  ;;  %v94_v60 = vld [vmem:[%s4192_s3 + $0x1c0] sm:$0xff]  ;;  %v95_v62 = vld [vmem:[%s4192_s3 + $0x1c8] sm:$0xff]  ;;  %v64_v63 = vld [vmem:[%s4192_s3 + $0xd0] sm:$0xff] }
  0x26   :  { %v96_v0 = vld [vmem:[%s4192_s3 + $0x1d0] sm:$0xff]  ;;  %v65_v1 = vld [vmem:[%s4192_s3 + $0xd8] sm:$0xff]  ;;  %v66_v3 = vld [vmem:[%s4192_s3 + $0xe0] sm:$0xff] }
  0x27   :  { %v97_v2 = vld [vmem:[%s4192_s3 + $0x1d8] sm:$0xff]  ;;  %v98_v4 = vld [vmem:[%s4192_s3 + $0x1e0] sm:$0xff]  ;;  %v67_v5 = vld [vmem:[%s4192_s3 + $0xe8] sm:$0xff] }
  0x28   :  { %3480 = vmatmul.mubr.msk.f32.gmra.mrb[14].mxu0 %vm106_vm0, %v53_v41  ;;  %3528 = vmatmul.mubr.msk.f32.gmra.mrb[14].mxu1 %vm106_vm0, %v85_v42  ;;  %v99_v6 = vld [vmem:[%s4192_s3 + $0x1e8] sm:$0xff]  ;;  %v68_v7 = vld [vmem:[%s4192_s3 + $0xf0] sm:$0xff]  ;;  %v69_v9 = vld [vmem:[%s4192_s3 + $0xf8] sm:$0xff] }
  0x29   :  { %3482 = vmatprep.mubr.msk.f32.mxu0 %vm106_vm0, %v54_v43  ;;  %3530 = vmatprep.mubr.msk.f32.mxu1 %vm106_vm0, %v86_v44  ;;  %v100_v8 = vld [vmem:[%s4192_s3 + $0x1f0] sm:$0xff]  ;;  %v101_v10 = vld [vmem:[%s4192_s3 + $0x1f8] sm:$0xff]  ;;  %v3256_v19 = vld [vmem:[%s4190_s1] ss:$0 sm:$0xff]  ;;  %s3680_s1 = smov [#allocation2]  }
  0x2a   :  { %v3257_v20 = vld [vmem:[%s4191_s2] ss:$0 sm:$0xff]  ;;  %v3106_v14 = vld [vmem:[#allocation6] sm:$0x1]  ;;  %s3143_s2 = sshll.u32 %s3680_s1, 4  ;;  %s4094_s2 = int_to_ptr.vmem [resolvable:$true] %s3143_s2 }
  0x2b   :  { %s3581_s21 = scalar_lea.vmem %s4094_s2, 16  ;;  %s3585_s22 = scalar_lea.vmem %s4094_s2, 32 }
  0x2c   :  { %3483 = vmatmul.mubr.msk.f32.gmra.mrb[16].mxu0 %vm106_vm0, %v55_v45  ;;  %3531 = vmatmul.mubr.msk.f32.gmra.mrb[16].mxu1 %vm106_vm0, %v87_v46  ;;  %p3582_p0 = scmp.ne.s32.totalorder %s4094_s2, %s3581_s21  ;;  %p3586_p1 = scmp.lt.s32.totalorder %s4094_s2, %s4094_s2 }
  0x2d   :  { %3485 = vmatprep.mubr.msk.f32.mxu0 %vm106_vm0, %v56_v47  ;;  %3533 = vmatprep.mubr.msk.f32.mxu1 %vm106_vm0, %v88_v48  ;;  %p3587_p2 = scmp.lt.s32.totalorder %s3585_s22, %s3581_s21 }
  0x2f   :  { %p3588_p3 = por %p3587_p2, %p3586_p1 }
  0x30   :  { %3486 = vmatmul.mubr.msk.f32.gmra.mrb[18].mxu0 %vm106_vm0, %v57_v49  ;;  %3534 = vmatmul.mubr.msk.f32.gmra.mrb[18].mxu1 %vm106_vm0, %v89_v50 }
  0x31   :  { %3488 = vmatprep.mubr.msk.f32.mxu0 %vm106_vm0, %v58_v51  ;;  %3536 = vmatprep.mubr.msk.f32.mxu1 %vm106_vm0, %v90_v52  ;;  %p3589_p4 = pnand %p3588_p3, %p3582_p0 }
  0x34   :  { %3489 = vmatmul.mubr.msk.f32.gmra.mrb[20].mxu0 %vm106_vm0, %v59_v53  ;;  %3537 = vmatmul.mubr.msk.f32.gmra.mrb[20].mxu1 %vm106_vm0, %v91_v54 }
  0x35   :  { %3491 = vmatprep.mubr.msk.f32.mxu0 %vm106_vm0, %v60_v55  ;;  %3539 = vmatprep.mubr.msk.f32.mxu1 %vm106_vm0, %v92_v56 }
  0x38   :  { %3492 = vmatmul.mubr.msk.f32.gmra.mrb[22].mxu0 %vm106_vm0, %v61_v57  ;;  %3540 = vmatmul.mubr.msk.f32.gmra.mrb[22].mxu1 %vm106_vm0, %v93_v58 }
  0x39   :  { %3494 = vmatprep.mubr.msk.f32.mxu0 %vm106_vm0, %v62_v59  ;;  %3542 = vmatprep.mubr.msk.f32.mxu1 %vm106_vm0, %v94_v60 }
  0x3c   :  { %3495 = vmatmul.mubr.msk.f32.gmra.mrb[24].mxu0 %vm106_vm0, %v63_v61  ;;  %3543 = vmatmul.mubr.msk.f32.gmra.mrb[24].mxu1 %vm106_vm0, %v95_v62 }
  0x3d   :  { %3497 = vmatprep.mubr.msk.f32.mxu0 %vm106_vm0, %v64_v63  ;;  %3545 = vmatprep.mubr.msk.f32.mxu1 %vm106_vm0, %v96_v0 }
  0x40   :  { %3498 = vmatmul.mubr.msk.f32.gmra.mrb[26].mxu0 %vm106_vm0, %v65_v1  ;;  %3546 = vmatmul.mubr.msk.f32.gmra.mrb[26].mxu1 %vm106_vm0, %v97_v2 }
  0x41   :  { %3500 = vmatprep.mubr.msk.f32.mxu0 %vm106_vm0, %v66_v3  ;;  %3548 = vmatprep.mubr.msk.f32.mxu1 %vm106_vm0, %v98_v4 }
  0x44   :  { %3501 = vmatmul.mubr.msk.f32.gmra.mrb[28].mxu0 %vm106_vm0, %v67_v5  ;;  %3549 = vmatmul.mubr.msk.f32.gmra.mrb[28].mxu1 %vm106_vm0, %v99_v6 }
  0x45   :  { %3503 = vmatprep.mubr.msk.f32.mxu0 %vm106_vm0, %v68_v7  ;;  %3551 = vmatprep.mubr.msk.f32.mxu1 %vm106_vm0, %v100_v8 }
  0x48   :  { %3504 = vmatmul.mubr.msk.f32.gmra.mrb[30].mxu0 %vm106_vm0, %v69_v9  ;;  %3552 = vmatmul.mubr.msk.f32.gmra.mrb[30].mxu1 %vm106_vm0, %v101_v10 }
  0x99   :  { %v752_v15 = vpop.permute.xlu0 %751  ;;  %v1398_v16 = vpop.permute.xlu1 %1397 }
  0x9a   :  { %vm1592_vm2 = vcmp.eq.s32.totalorder %v1398_v16, %v3257_v20  ;;  %v1075_v30 = vadd.f32 %v3256_v19, %v752_v15  ;;  %v3109_v15 = vld [vmem:[#allocation7] sm:$0x1] }
  0x9b   :  { %vm4028_vm5 = vmand %vm1592_vm2, %vm1856_vm1 }
  0x9c   :  { %vm4041_vm9 = vmxor %vm1592_vm2, %vm3679_vm7 }
  0x9d   :  { %v757_v21 = vpop.permute.xlu0 %756  ;;  %v1401_v23 = vpop.permute.xlu1 %1400 }
  0x9e   :  { %v1076_v26 = vadd.f32 %v3256_v19, %v757_v21  ;;  %vm1593_vm4 = vcmp.eq.s32.totalorder %v1401_v23, %v3257_v20  ;;  %v4063_v19 = vld [vmem:[#allocation7] sm:$0x1] }
  0x9f   :  { %vm4032_vm6 = vmand %vm1593_vm4, %vm1857_vm3 }
  0xa0   :  { %vm4036_vm8 = vmxor %vm1593_vm4, %vm3679_vm7 }
  0xdf   :  { %v3460_v24 = vpop.f32.mrb[0].mxu0  ;;  %v3508_v25 = vpop.f32.mrb[0].mxu1 }
  0xe0   :  { %v1140_v27 = vmul.f32 2.0, %v3460_v24  ;;  %v365_v28 = vpop.f32.mrb[1].mxu0  ;;  %v525_v29 = vpop.f32.mrb[1].mxu1 }
  0xe1   :  { %v1139_v31 = vmul.f32 2.0, %v365_v28 }
  0xe2   :  { %v1204_v32 = vsub.f32 %v1076_v26, %v1140_v27  ;;  %v4070_v26 = vld [vmem:[#allocation6] sm:$0x1] }
  0xe3   :  { %v1203_v34 = vsub.f32 %v1075_v30, %v1139_v31  ;;  %v3463_v35 = vpop.f32.mrb[2].mxu0  ;;  %v3511_v36 = vpop.f32.mrb[2].mxu1 }
  0xe4   :  { %v1268_v37 = vmax.f32 %v1204_v32, 0.0  ;;  %v375_v39 = vpop.f32.mrb[3].mxu0  ;;  %v535_v40 = vpop.f32.mrb[3].mxu1 }
  0xe5   :  { %v1267_v42 = vmax.f32 %v1203_v34, 0.0 }
  0xe6   :  { %v2177_v44 = vsel %vm4032_vm6, %v1268_v37, -inf  ;;  %v2241_v45 = vsel %vm4036_vm8, %v1268_v37, inf }
  0xe7   :  { %v2176_v46 = vsel %vm4028_vm5, %v1267_v42, -inf  ;;  %v2240_v47 = vsel %vm4041_vm9, %v1267_v42, inf  ;;  %v3466_v48 = vpop.f32.mrb[4].mxu0  ;;  %v3514_v49 = vpop.f32.mrb[4].mxu1 }
  0xe8   :  { %v2364_v50 = vmax.f32 %v2176_v46, %v2177_v44  ;;  %v2433_v51 = vmin.f32 %v2240_v47, %v2241_v45  ;;  %v385_v52 = vpop.f32.mrb[5].mxu0  ;;  %v545_v53 = vpop.f32.mrb[5].mxu1 }
  0xea   :  { %v2367_v54 = vrot.slane %v2364_v50, 4  ;;  %v2436_v55 = vrot.slane %v2433_v51, 4 }
  0xeb   :  { %v3469_v56 = vpop.f32.mrb[6].mxu0  ;;  %v3517_v57 = vpop.f32.mrb[6].mxu1 }
  0xec   :  { %v2368_v58 = vmax.f32 %v2364_v50, %v2367_v54  ;;  %v2437_v59 = vmin.f32 %v2433_v51, %v2436_v55  ;;  %v395_v60 = vpop.f32.mrb[7].mxu0  ;;  %v555_v61 = vpop.f32.mrb[7].mxu1 }
  0xee   :  { %v2369_v62 = vrot.slane %v2368_v58, 2  ;;  %v2438_v63 = vrot.slane %v2437_v59, 2 }
  0xef   :  { %v3472_v0 = vpop.f32.mrb[8].mxu0  ;;  %v3520_v1 = vpop.f32.mrb[8].mxu1 }
  0xf0   :  { %v2370_v2 = vmax.f32 %v2368_v58, %v2369_v62  ;;  %v2439_v3 = vmin.f32 %v2437_v59, %v2438_v63  ;;  %v405_v4 = vpop.f32.mrb[9].mxu0  ;;  %v565_v5 = vpop.f32.mrb[9].mxu1 }
  0xf2   :  { %v2371_v6 = vrot.slane %v2370_v2, 1  ;;  %v2440_v7 = vrot.slane %v2439_v3, 1 }
  0xf3   :  { %v3475_v8 = vpop.f32.mrb[10].mxu0  ;;  %v3523_v9 = vpop.f32.mrb[10].mxu1 }
  0xf4   :  { %v4053_v10 = vmax.f32 %v2370_v2, %v2371_v6  ;;  %v4055_v11 = vmin.f32 %v2439_v3, %v2440_v7  ;;  %v415_v12 = vpop.f32.mrb[11].mxu0  ;;  %v575_v13 = vpop.f32.mrb[11].mxu1 }
  0xf6   :  { %vm2442_vm10 = vcmp.eq.f32.partialorder %v2176_v46, %v4053_v10  ;;  %vm2443_vm11 = vcmp.eq.f32.partialorder %v2177_v44, %v4053_v10  ;;  %vm2769_vm12 = vcmp.eq.f32.partialorder %v2240_v47, %v4055_v11  ;;  %vm2770_vm13 = vcmp.eq.f32.partialorder %v2241_v45, %v4055_v11 }
  0xf7   :  { %vm2506_vm14 = vmand %vm4028_vm5, %vm2442_vm10  ;;  %v3478_v16 = vpop.f32.mrb[12].mxu0  ;;  %v3526_v18 = vpop.f32.mrb[12].mxu1  ;;  %v3107_v20 = vmax.f32 %v3106_v14, %v4053_v10  ;;  %v3110_v21 = vmin.f32 %v3109_v15, %v4055_v11 }
  0xf8   :  { %vm2507_vm15 = vmand %vm4032_vm6, %vm2443_vm11  ;;  %v2570_v23 = vsel %vm2506_vm14, %v4014_v17, 16  ;;  %v425_v24 = vpop.f32.mrb[13].mxu0  ;;  %v585_v25 = vpop.f32.mrb[13].mxu1 }
  0xf9   :  { %v2571_v27 = vsel %vm2507_vm15, %v4023_v22, 16  ;;  %vm2634_vm0 = vcmp.lt.s32.totalorder %v2570_v23, 16  ;;  %vm2833_vm1 = vmand %vm4041_vm9, %vm2769_vm12  ;;  %3108 = vst [vmem:[#allocation6] sm:$0x1] %v3107_v20 }
  0xfa   :  { %3111 = vst [vmem:[#allocation7] sm:$0x1] %v3110_v21  ;;  %v2635_v28 = vsel %vm2634_vm0, %v2570_v23, 16  ;;  %vm2636_vm2 = vcmp.lt.s32.totalorder %v2571_v27, 16  ;;  %vm2834_vm3 = vmand %vm4036_vm8, %vm2770_vm13  ;;  %v2897_v29 = vsel %vm2833_vm1, %v4014_v17, 16 }
  0xfb   :  { %v2637_v30 = vsel %vm2636_vm2, %v2571_v27, 16  ;;  %vm2642_vm4 = vcmp.lt.s32.totalorder %v2635_v28, 16  ;;  %v2898_v31 = vsel %vm2834_vm3, %v4023_v22, 16  ;;  %vm2961_vm5 = vcmp.lt.s32.totalorder %v2897_v29, 16  ;;  %v3481_v32 = vpop.f32.mrb[14].mxu0  ;;  %v3529_v33 = vpop.f32.mrb[14].mxu1 }
  0xfc   :  { %v2643_v34 = vsel %vm2642_vm4, %v2635_v28, 16  ;;  %vm2644_vm6 = vcmp.lt.s32.totalorder %v2637_v30, 16  ;;  %v2962_v35 = vsel %vm2961_vm5, %v2897_v29, 16  ;;  %vm2963_vm7 = vcmp.lt.s32.totalorder %v2898_v31, 16  ;;  %v435_v36 = vpop.f32.mrb[15].mxu0  ;;  %v595_v37 = vpop.f32.mrb[15].mxu1 }
  0xfd   :  { %v2645_v38 = vsel %vm2644_vm6, %v2637_v30, 16  ;;  %vm2650_vm9 = vcmp.lt.s32.totalorder %v2643_v34, 16  ;;  %v2964_v39 = vsel %vm2963_vm7, %v2898_v31, 16  ;;  %vm2969_vm10 = vcmp.lt.s32.totalorder %v2962_v35, 16 }
  0xfe   :  { %v2651_v40 = vsel %vm2650_vm9, %v2643_v34, 16  ;;  %vm2652_vm8 = vcmp.lt.s32.totalorder %v2645_v38, 16  ;;  %v2970_v17 = vsel %vm2969_vm10, %v2962_v35, 16  ;;  %vm2971_vm11 = vcmp.lt.s32.totalorder %v2964_v39, 16 }
  0xff   :  { %v2653_v41 = vsel %vm2652_vm8, %v2645_v38, 16  ;;  %vm2658_vm12 = vcmp.lt.s32.totalorder %v2651_v40, 16  ;;  %v2972_v22 = vsel %vm2971_vm11, %v2964_v39, 16  ;;  %vm2977_vm13 = vcmp.lt.s32.totalorder %v2970_v17, 16  ;;  %v3484_v42 = vpop.f32.mrb[16].mxu0  ;;  %v3532_v43 = vpop.f32.mrb[16].mxu1 }
 0x100   :  { %v2659_v44 = vsel %vm2658_vm12, %v2651_v40, 16  ;;  %vm2660_vm14 = vcmp.lt.s32.totalorder %v2653_v41, 16  ;;  %v2978_v45 = vsel %vm2977_vm13, %v2970_v17, 16  ;;  %vm2979_vm15 = vcmp.lt.s32.totalorder %v2972_v22, 16  ;;  %v445_v46 = vpop.f32.mrb[17].mxu0  ;;  %v605_v47 = vpop.f32.mrb[17].mxu1 }
 0x101   :  { %vm2666_vm0 = vcmp.lt.s32.totalorder %v2659_v44, 16  ;;  %v2980_v48 = vsel %vm2979_vm15, %v2972_v22, 16  ;;  %vm2985_vm1 = vcmp.lt.s32.totalorder %v2978_v45, 16  ;;  %v2661_v49 = vsel %vm2660_vm14, %v2653_v41, 16 }
 0x102   :  { %v2667_v50 = vsel %vm2666_vm0, %v2659_v44, 16  ;;  %v2986_v51 = vsel %vm2985_vm1, %v2978_v45, 16  ;;  %vm2987_vm2 = vcmp.lt.s32.totalorder %v2980_v48, 16  ;;  %vm2668_vm3 = vcmp.lt.s32.totalorder %v2661_v49, 16 }
 0x103   :  { %vm2674_vm4 = vcmp.lt.s32.totalorder %v2667_v50, 16  ;;  %vm2993_vm5 = vcmp.lt.s32.totalorder %v2986_v51, 16  ;;  %v3487_v52 = vpop.f32.mrb[18].mxu0  ;;  %v3535_v53 = vpop.f32.mrb[18].mxu1  ;;  %v2988_v54 = vsel %vm2987_vm2, %v2980_v48, 16  ;;  %v2669_v55 = vsel %vm2668_vm3, %v2661_v49, 16 }
 0x104   :  { %v2675_v56 = vsel %vm2674_vm4, %v2667_v50, 16  ;;  %v2994_v57 = vsel %vm2993_vm5, %v2986_v51, 16  ;;  %v455_v58 = vpop.f32.mrb[19].mxu0  ;;  %v615_v59 = vpop.f32.mrb[19].mxu1  ;;  %vm2995_vm6 = vcmp.lt.s32.totalorder %v2988_v54, 16  ;;  %vm2676_vm7 = vcmp.lt.s32.totalorder %v2669_v55, 16 }
 0x105   :  { %vm2682_vm9 = vcmp.lt.s32.totalorder %v2675_v56, 16  ;;  %vm3001_vm10 = vcmp.lt.s32.totalorder %v2994_v57, 16  ;;  %v2996_v60 = vsel %vm2995_vm6, %v2988_v54, 16  ;;  %v2677_v61 = vsel %vm2676_vm7, %v2669_v55, 16  ;;  %v4083_v50 = vld [vmem:[#allocation6] sm:$0x1] }
 0x106   :  { %v2683_v62 = vsel %vm2682_vm9, %v2675_v56, 16  ;;  %v3002_v63 = vsel %vm3001_vm10, %v2994_v57, 16  ;;  %vm3003_vm8 = vcmp.lt.s32.totalorder %v2996_v60, 16  ;;  %vm2684_vm11 = vcmp.lt.s32.totalorder %v2677_v61, 16  ;;  %v3127_v53 = vld [vmem:[#allocation7] sm:$0x1] }
 0x107   :  { %vm2690_vm12 = vcmp.lt.s32.totalorder %v2683_v62, 16  ;;  %vm3009_vm13 = vcmp.lt.s32.totalorder %v3002_v63, 16  ;;  %v3490_v0 = vpop.f32.mrb[20].mxu0  ;;  %v3538_v1 = vpop.f32.mrb[20].mxu1  ;;  %v3004_v2 = vsel %vm3003_vm8, %v2996_v60, 16  ;;  %v2685_v3 = vsel %vm2684_vm11, %v2677_v61, 16 }
 0x108   :  { %v2691_v4 = vsel %vm2690_vm12, %v2683_v62, 16  ;;  %v3010_v5 = vsel %vm3009_vm13, %v3002_v63, 16  ;;  %v465_v6 = vpop.f32.mrb[21].mxu0  ;;  %v625_v7 = vpop.f32.mrb[21].mxu1  ;;  %vm3011_vm14 = vcmp.lt.s32.totalorder %v3004_v2, 16  ;;  %vm2692_vm15 = vcmp.lt.s32.totalorder %v2685_v3, 16 }
 0x109   :  { %vm2698_vm0 = vcmp.lt.s32.totalorder %v2691_v4, 16  ;;  %vm3017_vm1 = vcmp.lt.s32.totalorder %v3010_v5, 16  ;;  %v3012_v8 = vsel %vm3011_vm14, %v3004_v2, 16  ;;  %v2693_v9 = vsel %vm2692_vm15, %v2685_v3, 16 }
 0x10a   :  { %v2699_v12 = vsel %vm2698_vm0, %v2691_v4, 16  ;;  %v3018_v13 = vsel %vm3017_vm1, %v3010_v5, 16  ;;  %vm3019_vm2 = vcmp.lt.s32.totalorder %v3012_v8, 16  ;;  %vm2700_vm3 = vcmp.lt.s32.totalorder %v2693_v9, 16 }
 0x10b   :  { %vm2706_vm4 = vcmp.lt.s32.totalorder %v2699_v12, 16  ;;  %vm3025_vm5 = vcmp.lt.s32.totalorder %v3018_v13, 16  ;;  %v3493_v14 = vpop.f32.mrb[22].mxu0  ;;  %v3541_v15 = vpop.f32.mrb[22].mxu1  ;;  %v3020_v16 = vsel %vm3019_vm2, %v3012_v8, 16  ;;  %v2701_v18 = vsel %vm2700_vm3, %v2693_v9, 16 }
 0x10c   :  { %v2707_v20 = vsel %vm2706_vm4, %v2699_v12, 16  ;;  %v3026_v21 = vsel %vm3025_vm5, %v3018_v13, 16  ;;  %v475_v23 = vpop.f32.mrb[23].mxu0  ;;  %v635_v24 = vpop.f32.mrb[23].mxu1  ;;  %vm3027_vm6 = vcmp.lt.s32.totalorder %v3020_v16, 16  ;;  %vm2708_vm7 = vcmp.lt.s32.totalorder %v2701_v18, 16 }
 0x10d   :  { %vm2714_vm9 = vcmp.lt.s32.totalorder %v2707_v20, 16  ;;  %vm3033_vm10 = vcmp.lt.s32.totalorder %v3026_v21, 16  ;;  %v3028_v25 = vsel %vm3027_vm6, %v3020_v16, 16  ;;  %v2709_v27 = vsel %vm2708_vm7, %v2701_v18, 16  ;;  %v3100_v23 = vld [vmem:[#allocation2] sm:$0x1] }
 0x10e   :  { %v3034_v28 = vsel %vm3033_vm10, %v3026_v21, 16  ;;  %vm3035_vm8 = vcmp.lt.s32.totalorder %v3028_v25, 16  ;;  %v2715_v29 = vsel %vm2714_vm9, %v2707_v20, 16  ;;  %vm2716_vm11 = vcmp.lt.s32.totalorder %v2709_v27, 16 }
 0x10f   :  { %vm3041_vm12 = vcmp.lt.s32.totalorder %v3034_v28, 16  ;;  %v3496_v30 = vpop.f32.mrb[24].mxu0  ;;  %v3544_v31 = vpop.f32.mrb[24].mxu1  ;;  %v3036_v32 = vsel %vm3035_vm8, %v3028_v25, 16  ;;  %v2717_v33 = vsel %vm2716_vm11, %v2709_v27, 16  ;;  %vm2722_vm13 = vcmp.lt.s32.totalorder %v2715_v29, 16 }
 0x110   :  { %v485_v34 = vpop.f32.mrb[25].mxu0  ;;  %v645_v35 = vpop.f32.mrb[25].mxu1  ;;  %v3042_v36 = vsel %vm3041_vm12, %v3034_v28, 16  ;;  %vm3043_vm14 = vcmp.lt.s32.totalorder %v3036_v32, 16  ;;  %v2723_v37 = vsel %vm2722_vm13, %v2715_v29, 16  ;;  %vm2724_vm15 = vcmp.lt.s32.totalorder %v2717_v33, 16 }
 0x111   :  { %v3044_v38 = vsel %vm3043_vm14, %v3036_v32, 16  ;;  %vm3049_vm0 = vcmp.lt.s32.totalorder %v3042_v36, 16  ;;  %v2725_v39 = vsel %vm2724_vm15, %v2717_v33, 16  ;;  %vm2730_vm1 = vcmp.lt.s32.totalorder %v2723_v37, 16  ;;  %v3103_v29 = vld [vmem:[#allocation4] sm:$0x1] }
 0x112   :  { %v3050_v40 = vsel %vm3049_vm0, %v3042_v36, 16  ;;  %vm3051_vm2 = vcmp.lt.s32.totalorder %v3044_v38, 16  ;;  %v2731_v17 = vsel %vm2730_vm1, %v2723_v37, 16  ;;  %vm2732_vm3 = vcmp.lt.s32.totalorder %v2725_v39, 16 }
 0x113   :  { %v3499_v41 = vpop.f32.mrb[26].mxu0  ;;  %v3547_v22 = vpop.f32.mrb[26].mxu1  ;;  %v3052_v42 = vsel %vm3051_vm2, %v3044_v38, 16  ;;  %vm3057_vm4 = vcmp.lt.s32.totalorder %v3050_v40, 16  ;;  %v2733_v43 = vsel %vm2732_vm3, %v2725_v39, 16  ;;  %vm2738_vm5 = vcmp.lt.s32.totalorder %v2731_v17, 16 }
 0x114   :  { %v495_v44 = vpop.f32.mrb[27].mxu0  ;;  %v655_v45 = vpop.f32.mrb[27].mxu1  ;;  %v3058_v46 = vsel %vm3057_vm4, %v3050_v40, 16  ;;  %vm3059_vm6 = vcmp.lt.s32.totalorder %v3052_v42, 16  ;;  %v2739_v47 = vsel %vm2738_vm5, %v2731_v17, 16  ;;  %vm2740_vm7 = vcmp.lt.s32.totalorder %v2733_v43, 16 }
 0x115   :  { %v3060_v48 = vsel %vm3059_vm6, %v3052_v42, 16  ;;  %vm3065_vm9 = vcmp.lt.s32.totalorder %v3058_v46, 16  ;;  %v2741_v49 = vsel %vm2740_vm7, %v2733_v43, 16  ;;  %vm2746_vm10 = vcmp.lt.s32.totalorder %v2739_v47, 16 }
 0x116   :  { %v3066_v51 = vsel %vm3065_vm9, %v3058_v46, 16  ;;  %vm3067_vm8 = vcmp.lt.s32.totalorder %v3060_v48, 16  ;;  %v2747_v52 = vsel %vm2746_vm10, %v2739_v47, 16  ;;  %vm2748_vm11 = vcmp.lt.s32.totalorder %v2741_v49, 16 }
 0x117   :  { %v3502_v54 = vpop.f32.mrb[28].mxu0  ;;  %v3550_v55 = vpop.f32.mrb[28].mxu1  ;;  %v3068_v56 = vsel %vm3067_vm8, %v3060_v48, 16  ;;  %vm3073_vm12 = vcmp.lt.s32.totalorder %v3066_v51, 16  ;;  %v2749_v57 = vsel %vm2748_vm11, %v2741_v49, 16  ;;  %v3117_v61 = vmax.f32 %v4083_v50, 0.0 }
 0x118   :  { %v505_v58 = vpop.f32.mrb[29].mxu0  ;;  %v665_v59 = vpop.f32.mrb[29].mxu1  ;;  %v3074_v60 = vsel %vm3073_vm12, %v3066_v51, 16  ;;  %vm3075_vm13 = vcmp.lt.s32.totalorder %v3068_v56, 16  ;;  %vm2754_vm14 = vcmp.lt.s32.totalorder %v2747_v52, %v2749_v57  ;;  %v4086_v0 = vmax.f32 %v3127_v53, 0.0 }
 0x119   :  { %v3076_v62 = vsel %vm3075_vm13, %v3068_v56, 16  ;;  %v2755_v63 = vsel %vm2754_vm14, %v2747_v52, %v2749_v57  ;;  %3577 = vrsqrt.f32 %v3117_v61  ;;  %vm3099_vm6 = vcmp.lt.f32.partialorder %v4055_v11, %v4063_v19 }
 0x11a   :  { %vm3081_vm15 = vcmp.lt.s32.totalorder %v3074_v60, %v3076_v62  ;;  %vm2758_vm0 = vcmp.lt.s32.totalorder %v2755_v63, 16  ;;  %3579 = vrsqrt.f32 %v4086_v0  ;;  %vm3097_vm7 = vcmp.gt.f32.partialorder %v4053_v10, %v4070_v26 }
 0x11b   :  { %v3505_v1 = vpop.f32.mrb[30].mxu0  ;;  %v3553_v2 = vpop.f32.mrb[30].mxu1  ;;  %v3082_v3 = vsel %vm3081_vm15, %v3074_v60, %v3076_v62  ;;  %v2759_v4 = vsel %vm2758_vm0, %v2755_v63, 16  ;;  %vm3116_vm9 = vcmp.eq.f32.partialorder %v4083_v50, -inf  ;;  %vm3120_vm10 = vcmp.eq.f32.partialorder %v3117_v61, inf }
 0x11c   :  { %v515_v5 = vpop.f32.mrb[31].mxu0  ;;  %v675_v6 = vpop.f32.mrb[31].mxu1  ;;  %vm3085_vm1 = vcmp.lt.s32.totalorder %v3082_v3, 16  ;;  %v2760_v7 = vrot.slane %v2759_v4, 4  ;;  %vm3122_vm11 = vcmp.eq.f32.partialorder %v3117_v61, 0.0  ;;  %v3123_v28 = vand.u32 2147483648, %v3117_v61 }
 0x11d   :  { %v3086_v8 = vsel %vm3085_vm1, %v3082_v3, 16  ;;  %vm3131_vm12 = vcmp.eq.f32.partialorder %v4086_v0, inf  ;;  %v3134_v35 = vand.u32 2147483648, %v4086_v0  ;;  %vm3133_vm14 = vcmp.eq.f32.partialorder %v4086_v0, 0.0 }
 0x11e   :  { %v3087_v9 = vrot.slane %v3086_v8, 4  ;;  %vm2761_vm2 = vcmp.lt.s32.totalorder %v2759_v4, %v2760_v7 }
 0x11f   :  { %v2762_v12 = vsel %vm2761_vm2, %v2759_v4, %v2760_v7 }
 0x120   :  { %vm3088_vm3 = vcmp.lt.s32.totalorder %v3086_v8, %v3087_v9  ;;  %v2763_v13 = vrot.slane %v2762_v12, 2 }
 0x121   :  { %v3089_v14 = vsel %vm3088_vm3, %v3086_v8, %v3087_v9 }
 0x122   :  { %v3090_v15 = vrot.slane %v3089_v14, 2  ;;  %vm2764_vm4 = vcmp.lt.s32.totalorder %v2762_v12, %v2763_v13 }
 0x123   :  { %v2765_v16 = vsel %vm2764_vm4, %v2762_v12, %v2763_v13  ;;  %v3578_v18 = vpop.eup %3577 }
 0x124   :  { %vm3091_vm5 = vcmp.lt.s32.totalorder %v3089_v14, %v3090_v15  ;;  %v2766_v20 = vrot.slane %v2765_v16, 1  ;;  %v3119_v24 = vmul.f32 %v3578_v18, %v3117_v61  ;;  %v3580_v25 = vpop.eup %3579 }
 0x125   :  { %v3092_v21 = vsel %vm3091_vm5, %v3089_v14, %v3090_v15  ;;  %v3130_v32 = vmul.f32 %v3580_v25, %v4086_v0 }
 0x126   :  { %v3093_v27 = vrot.slane %v3092_v21, 1  ;;  %vm2767_vm8 = vcmp.lt.s32.totalorder %v2765_v16, %v2766_v20  ;;  %v3121_v31 = vsel %vm3120_vm10, %v3117_v61, %v3119_v24 }
 0x127   :  { %v2768_v30 = vsel %vm2767_vm8, %v2765_v16, %v2766_v20  ;;  %v3124_v34 = vsel %vm3122_vm11, %v3123_v28, %v3121_v31  ;;  %v3132_v38 = vsel %vm3131_vm12, %v4086_v0, %v3130_v32 }
 0x128   :  { %vm3094_vm13 = vcmp.lt.s32.totalorder %v3092_v21, %v3093_v27  ;;  %v3101_v33 = vsel %vm3097_vm7, %v2768_v30, %v3100_v23  ;;  %v3125_v37 = vsel %vm3116_vm9, -inf, %v3124_v34 }
 0x129   :  { %v3095_v36 = vsel %vm3094_vm13, %v3092_v21, %v3093_v27  ;;  %3102 = vst [vmem:[#allocation2] sm:$0x1] %v3101_v33 }
 0x12a   :  { %v3104_v10 = vsel %vm3099_vm6, %v3095_v36, %v3103_v29 }
 0x12b   :  { %3592 = shalt.err (!%p3589_p4)
}
 0x12c   :  { %s3593_s25 = scalar_lea.hbm %s4195_s6, 16 }
 0x12d   :  { %p3594_p5 = scmp.ne.s32.totalorder %s4195_s6, %s3593_s25  ;;  %p3597_p6 = scmp.lt.u32.totalorder %s3593_s25, %s4195_s6 }
 0x12f   :  { %p3599_p7 = pnand %p3597_p6, %p3594_p5 }
 0x131   :  { %3602 = shalt.err (!%p3599_p7)
}
 0x132   :  { %3146 = dma.vmem_to_hbm [thread:$0]  %s4094_s2, 16, %s4195_s6, [#allocation3]   ;;  %3126 = vst [vmem:[#allocation6] sm:$0x1] %v3125_v37  ;;  %v3135_v11 = vsel %vm3133_vm14, %v3134_v35, %v3132_v38  ;;  %3105 = vst [vmem:[#allocation4] sm:$0x1] %v3104_v10 }
 0x133   :  { %3136 = vst [vmem:[#allocation7] sm:$0x1] %v3135_v11  ;;  %s3603_s30 = scalar_lea.vmem %s4102_s17, 16  ;;  %s3607_s10 = scalar_lea.vmem %s4102_s17, 32 }
 0x134   :  { %p3604_p8 = scmp.ne.s32.totalorder %s4102_s17, %s3603_s30  ;;  %p3608_p9 = scmp.lt.s32.totalorder %s4102_s17, %s4102_s17 }
 0x135   :  { %p3609_p10 = scmp.lt.s32.totalorder %s3607_s10, %s3603_s30 }
 0x137   :  { %p3610_p11 = por %p3609_p10, %p3608_p9 }
 0x139   :  { %p3611_p12 = pnand %p3610_p11, %p3604_p8 }
 0x13b   :  { %3614 = shalt.err (!%p3611_p12)
}
 0x13c   :  { %s3615_s6 = scalar_lea.hbm %s4196_s7, 16 }
 0x13d   :  { %p3616_p13 = scmp.ne.s32.totalorder %s4196_s7, %s3615_s6  ;;  %p3619_p0 = scmp.lt.u32.totalorder %s3615_s6, %s4196_s7 }
 0x13f   :  { %p3621_p1 = pnand %p3619_p0, %p3616_p13 }
 0x141   :  { %3624 = shalt.err (!%p3621_p1)
}
 0x142   :  { %3156 = dma.vmem_to_hbm [thread:$0]  %s4102_s17, 16, %s4196_s7, [#allocation5]  }
 0x143   :  { %s3625_s16 = scalar_lea.vmem %s4106_s19, 16  ;;  %s3629_s18 = scalar_lea.vmem %s4106_s19, 32 }
 0x144   :  { %p3626_p2 = scmp.ne.s32.totalorder %s4106_s19, %s3625_s16  ;;  %p3630_p3 = scmp.lt.s32.totalorder %s4106_s19, %s4106_s19 }
 0x145   :  { %p3631_p4 = scmp.lt.s32.totalorder %s3629_s18, %s3625_s16 }
 0x147   :  { %p3632_p5 = por %p3631_p4, %p3630_p3 }
 0x149   :  { %p3633_p6 = pnand %p3632_p5, %p3626_p2 }
 0x14b   :  { %3636 = shalt.err (!%p3633_p6)
}
 0x14c   :  { %s3637_s22 = scalar_lea.hbm %s4197_s8, 16 }
 0x14d   :  { %p3638_p7 = scmp.ne.s32.totalorder %s4197_s8, %s3637_s22  ;;  %p3641_p8 = scmp.lt.u32.totalorder %s3637_s22, %s4197_s8 }
 0x14f   :  { %p3643_p9 = pnand %p3641_p8, %p3638_p7 }
 0x151   :  { %3646 = shalt.err (!%p3643_p9)
}
 0x152   :  { %3166 = dma.vmem_to_hbm [thread:$0]  %s4106_s19, 16, %s4197_s8, [#allocation5]  }
 0x153   :  { %s3647_s27 = scalar_lea.vmem %s4133_s0, 16  ;;  %s3651_s5 = scalar_lea.vmem %s4133_s0, 32 }
 0x154   :  { %p3648_p10 = scmp.ne.s32.totalorder %s4133_s0, %s3647_s27  ;;  %p3652_p11 = scmp.lt.s32.totalorder %s4133_s0, %s4133_s0 }
 0x155   :  { %p3653_p12 = scmp.lt.s32.totalorder %s3651_s5, %s3647_s27 }
 0x157   :  { %p3654_p13 = por %p3653_p12, %p3652_p11 }
 0x159   :  { %p3655_p0 = pnand %p3654_p13, %p3648_p10 }
 0x15b   :  { %3658 = shalt.err (!%p3655_p0)
}
 0x15c   :  { %s3659_s29 = scalar_lea.hbm %s4198_s9, 16 }
 0x15d   :  { %p3660_p1 = scmp.ne.s32.totalorder %s4198_s9, %s3659_s29  ;;  %p3663_p2 = scmp.lt.u32.totalorder %s3659_s29, %s4198_s9 }
 0x15f   :  { %p3665_p3 = pnand %p3663_p2, %p3660_p1 }
 0x161   :  { %3668 = shalt.err (!%p3665_p3)
}
 0x162   :  { %3176 = dma.vmem_to_hbm [thread:$0]  %s4133_s0, 16, %s4198_s9, [#allocation8]  }
 0x163   :  { %3669 = dma.done.wait [#allocation3], 16  }
 0x164   :  { %3670 = vsyncadd [#allocation3], 4294967280 }
 0x165   :  { %3671 = dma.done.wait [#allocation5], 32  }
 0x166   :  { %3672 = vsyncadd [#allocation5], 4294967264 }
 0x167   :  { %3673 = dma.done.wait [#allocation8], 16  }
 0x168   :  { %3674 = vsyncadd [#allocation8], 4294967280 }
 0x169   :  { %3189 = vsyncpa [#allocation3], 1 }
 0x16a   :  { %3190 = vsyncpa [#allocation5], 1 }
 0x16b   :  { %3191 = vsyncpa [#allocation8], 1 }

</bundles_post_ra>
